<compile_context>
chip_gen: v7x
topology: tpu7x:2x2x1
jax: 0.10.0
libtpu: 0.0.40
codegen_flags: <defaults>
</compile_context>

<pallas_src>
import jax
import jax.numpy as jnp
from jax.experimental import pallas as pl
from jax.experimental.pallas import tpu as pltpu


def mlp_kernel(x_ref, w1_ref, b1_ref, w2_ref, b2_ref, w3_ref, b3_ref, o_ref):
    # Layer 1: Linear + ReLU  (MXU matmul, f32 accumulate)
    h1 = jnp.dot(x_ref[...], w1_ref[...], preferred_element_type=jnp.float32)
    h1 = jnp.maximum(h1 + b1_ref[...], 0.0)
    # Layer 2: Linear + ReLU (cast activation to weight dtype -> full-rate MXU)
    h2 = jnp.dot(h1.astype(w2_ref.dtype), w2_ref[...],
                 preferred_element_type=jnp.float32)
    h2 = jnp.maximum(h2 + b2_ref[...], 0.0)
    # Output layer: Linear (no activation), 128-lane padded output
    y = jnp.dot(h2.astype(w3_ref.dtype), w3_ref[...],
                preferred_element_type=jnp.float32)
    o_ref[...] = (y + b3_ref[...]).astype(o_ref.dtype)


def mlp_forward(x, w1, b1, w2, b2, w3, b3, *, tm=512,
                compute_dtype=jnp.bfloat16):
    """Fused 3-layer MLP.

    x:      (B, D)        D = word_len (128)
    w1, w2: (D, D)        pre-transposed (in, out)
    w3:     (D, n_out)    n_out = 17
    b*:     (1, out)
    Returns (B, n_out) float32 logits.
    """
    B, D = x.shape
    n_out = w3.shape[1]
    n_pad = pl.cdiv(n_out, 128) * 128          # lane-dense output width (128)

    # --- Pad final layer to a lane-dense width (extra columns are exact zeros).
    w3p = jnp.zeros((D, n_pad), w3.dtype).at[:, :n_out].set(w3)
    b3p = jnp.zeros((1, n_pad), b3.dtype).at[:, :n_out].set(b3)

    # --- Compute-dtype inputs for the MXU; biases/accumulation stay f32.
    xc = x.astype(compute_dtype)
    w1c = w1.astype(compute_dtype)
    w2c = w2.astype(compute_dtype)
    w3c = w3p.astype(compute_dtype)

    # --- Batch tiling: tile must be a multiple of 8 sublanes; pad B to fit.
    tm = min(tm, max(8, pl.cdiv(B, 8) * 8))
    b_pad = pl.cdiv(B, tm) * tm
    if b_pad != B:
        xc = jnp.zeros((b_pad, D), xc.dtype).at[:B].set(xc)

    grid = (b_pad // tm,)

    itemsize = jnp.dtype(compute_dtype).itemsize
    flops = 2 * b_pad * D * (D + D + n_pad)
    bytes_accessed = (
        b_pad * D * itemsize            # x read
        + b_pad * n_pad * 4             # output write (f32)
        + (D * D * 2 + D * n_pad) * itemsize   # weights (read once, resident)
        + (2 * D + n_pad) * 4           # biases (f32)
    )

    out = pl.pallas_call(
        mlp_kernel,
        out_shape=jax.ShapeDtypeStruct((b_pad, n_pad), jnp.float32),
        grid_spec=pltpu.PrefetchScalarGridSpec(
            num_scalar_prefetch=0,
            grid=grid,
            in_specs=[
                pl.BlockSpec((tm, D), lambda i: (i, 0)),       # x: streamed
                pl.BlockSpec((D, D), lambda i: (0, 0)),        # w1: resident
                pl.BlockSpec((1, D), lambda i: (0, 0)),        # b1
                pl.BlockSpec((D, D), lambda i: (0, 0)),        # w2
                pl.BlockSpec((1, D), lambda i: (0, 0)),        # b2
                pl.BlockSpec((D, n_pad), lambda i: (0, 0)),    # w3 (padded)
                pl.BlockSpec((1, n_pad), lambda i: (0, 0)),    # b3 (padded)
            ],
            out_specs=pl.BlockSpec((tm, n_pad), lambda i: (i, 0)),
        ),
        compiler_params=pltpu.CompilerParams(
            dimension_semantics=("parallel",),     # shard batch across TCs (v7x)
        ),
        cost_estimate=pl.CostEstimate(
            flops=flops, transcendentals=0, bytes_accessed=bytes_accessed),
    )(xc, w1c, b1, w2c, b2, w3c, b3p)

    # Drop batch padding and the zero-padded logit columns.
    return out[:B, :n_out]


def init_params(key, word_len, n_classes=17):
    """Deterministic synthetic parameters (PyTorch-style uniform fan-in init).
    Weights are returned already transposed to (in, out), float32."""
    ks = jax.random.split(key, 6)

    def linear(kw, kb, fan_in, fan_out):
        bound = 1.0 / jnp.sqrt(fan_in)
        w = jax.random.uniform(kw, (fan_in, fan_out), jnp.float32, -bound, bound)
        b = jax.random.uniform(kb, (1, fan_out), jnp.float32, -bound, bound)
        return w, b

    w1, b1 = linear(ks[0], ks[1], word_len, word_len)
    w2, b2 = linear(ks[2], ks[3], word_len, word_len)
    w3, b3 = linear(ks[4], ks[5], word_len, n_classes)
    return w1, b1, w2, b2, w3, b3


if __name__ == "__main__":
    key = jax.random.PRNGKey(0)
    k_x, k_p = jax.random.split(key)

    batch = 64
    word_len = 128   # bag-of-words feature length
    n_classes = 17

    x = jax.random.normal(k_x, (batch, word_len), jnp.float32)
    w1, b1, w2, b2, w3, b3 = init_params(k_p, word_len, n_classes)

    out = mlp_forward(x, w1, b1, w2, b2, w3, b3)
    out = jax.block_until_ready(out)
    assert out.shape == (batch, n_classes)

    # Pure-JAX reference that mimics the kernel's bf16-input / f32-accumulate
    # numerics, for a tight correctness check.
    def q(a):  # bf16 quantize then back to f32
        return a.astype(jnp.bfloat16).astype(jnp.float32)
    h1 = jnp.maximum(q(x) @ q(w1) + b1, 0.0)
    h2 = jnp.maximum(q(h1) @ q(w2) + b2, 0.0)
    ref = q(h2) @ q(w3) + b3

    assert jnp.allclose(out, ref, atol=1e-2, rtol=1e-2), (
        float(jnp.max(jnp.abs(out - ref))))

    print("KERNEL_OK")
</pallas_src>

<mosaic_0001>
module attributes {stable_mosaic.version = 11 : i64} {
  func.func @mlp_kernel(%arg0: i32, %arg1: memref<64x128xbf16, #tpu.memory_space<vmem>>, %arg2: memref<128x128xbf16, #tpu.memory_space<vmem>>, %arg3: memref<1x128xf32, #tpu.memory_space<vmem>>, %arg4: memref<128x128xbf16, #tpu.memory_space<vmem>>, %arg5: memref<1x128xf32, #tpu.memory_space<vmem>>, %arg6: memref<128x128xbf16, #tpu.memory_space<vmem>>, %arg7: memref<1x128xf32, #tpu.memory_space<vmem>>, %arg8: memref<64x128xf32, #tpu.memory_space<vmem>>) attributes {dimension_semantics = [#tpu.dimension_semantics<parallel>], iteration_bounds = array<i64: 1>, scalar_prefetch = 0 : i64, scratch_operands = 0 : i64, tpu.core_type = #tpu.core_type<tc>, window_params = [{transform_indices = @transform_0, window_bounds = array<i64: 64, 128>}, {pipeline_mode = #tpu.pipeline_mode<synchronous>, transform_indices = @transform_1, window_bounds = array<i64: 128, 128>}, {pipeline_mode = #tpu.pipeline_mode<synchronous>, transform_indices = @transform_2, window_bounds = array<i64: 1, 128>}, {pipeline_mode = #tpu.pipeline_mode<synchronous>, transform_indices = @transform_3, window_bounds = array<i64: 128, 128>}, {pipeline_mode = #tpu.pipeline_mode<synchronous>, transform_indices = @transform_4, window_bounds = array<i64: 1, 128>}, {pipeline_mode = #tpu.pipeline_mode<synchronous>, transform_indices = @transform_5, window_bounds = array<i64: 128, 128>}, {pipeline_mode = #tpu.pipeline_mode<synchronous>, transform_indices = @transform_6, window_bounds = array<i64: 1, 128>}, {transform_indices = @transform_7, window_bounds = array<i64: 64, 128>}]} {
    %c0 = arith.constant 0 : index
    %c0_0 = arith.constant 0 : index
    %0 = vector.load %arg1[%c0, %c0_0] : memref<64x128xbf16, #tpu.memory_space<vmem>>, vector<64x128xbf16>
    %c0_1 = arith.constant 0 : index
    %c0_2 = arith.constant 0 : index
    %1 = vector.load %arg2[%c0_1, %c0_2] : memref<128x128xbf16, #tpu.memory_space<vmem>>, vector<128x128xbf16>
    %cst = arith.constant dense<0.000000e+00> : vector<64x128xf32>
    %2 = tpu.matmul %0, %1, %cst {dimension_numbers = #tpu.dot_dimension_numbers<[1], [0], [0], [1], [0, 0, 1, 1], [], []>} : vector<64x128xbf16>, vector<128x128xbf16>, vector<64x128xf32> -> vector<64x128xf32>
    %c0_3 = arith.constant 0 : index
    %c0_4 = arith.constant 0 : index
    %3 = vector.load %arg3[%c0_3, %c0_4] : memref<1x128xf32, #tpu.memory_space<vmem>>, vector<1x128xf32>
    %4 = vector.broadcast %3 : vector<1x128xf32> to vector<64x128xf32>
    %5 = arith.addf %2, %4 : vector<64x128xf32>
    %cst_5 = arith.constant 0.000000e+00 : f32
    %6 = vector.broadcast %cst_5 : f32 to vector<64x128xf32>
    %7 = arith.maximumf %5, %6 : vector<64x128xf32>
    %8 = arith.truncf %7 : vector<64x128xf32> to vector<64x128xbf16>
    %c0_6 = arith.constant 0 : index
    %c0_7 = arith.constant 0 : index
    %9 = vector.load %arg4[%c0_6, %c0_7] : memref<128x128xbf16, #tpu.memory_space<vmem>>, vector<128x128xbf16>
    %cst_8 = arith.constant dense<0.000000e+00> : vector<64x128xf32>
    %10 = tpu.matmul %8, %9, %cst_8 {dimension_numbers = #tpu.dot_dimension_numbers<[1], [0], [0], [1], [0, 0, 1, 1], [], []>} : vector<64x128xbf16>, vector<128x128xbf16>, vector<64x128xf32> -> vector<64x128xf32>
    %c0_9 = arith.constant 0 : index
    %c0_10 = arith.constant 0 : index
    %11 = vector.load %arg5[%c0_9, %c0_10] : memref<1x128xf32, #tpu.memory_space<vmem>>, vector<1x128xf32>
    %12 = vector.broadcast %11 : vector<1x128xf32> to vector<64x128xf32>
    %13 = arith.addf %10, %12 : vector<64x128xf32>
    %cst_11 = arith.constant 0.000000e+00 : f32
    %14 = vector.broadcast %cst_11 : f32 to vector<64x128xf32>
    %15 = arith.maximumf %13, %14 : vector<64x128xf32>
    %16 = arith.truncf %15 : vector<64x128xf32> to vector<64x128xbf16>
    %c0_12 = arith.constant 0 : index
    %c0_13 = arith.constant 0 : index
    %17 = vector.load %arg6[%c0_12, %c0_13] : memref<128x128xbf16, #tpu.memory_space<vmem>>, vector<128x128xbf16>
    %cst_14 = arith.constant dense<0.000000e+00> : vector<64x128xf32>
    %18 = tpu.matmul %16, %17, %cst_14 {dimension_numbers = #tpu.dot_dimension_numbers<[1], [0], [0], [1], [0, 0, 1, 1], [], []>} : vector<64x128xbf16>, vector<128x128xbf16>, vector<64x128xf32> -> vector<64x128xf32>
    %c0_15 = arith.constant 0 : index
    %c0_16 = arith.constant 0 : index
    %19 = vector.load %arg7[%c0_15, %c0_16] : memref<1x128xf32, #tpu.memory_space<vmem>>, vector<1x128xf32>
    %20 = vector.broadcast %19 : vector<1x128xf32> to vector<64x128xf32>
    %21 = arith.addf %18, %20 : vector<64x128xf32>
    %c0_17 = arith.constant 0 : index
    %c0_18 = arith.constant 0 : index
    %22 = vector.load %arg8[%c0_17, %c0_18] : memref<64x128xf32, #tpu.memory_space<vmem>>, vector<64x128xf32>
    tpu.vector_store %arg8[%c0_17, %c0_18], %21 {strides = array<i32>} : memref<64x128xf32, #tpu.memory_space<vmem>>, vector<64x128xf32>,
    return
  }
  func.func @transform_0(%arg0: i32) -> (i32, i32) {
    %c0_i32 = arith.constant 0 : i32
    %c0_i32_0 = arith.constant 0 : i32
    return %arg0, %c0_i32 : i32, i32
  }
  func.func @transform_1(%arg0: i32) -> (i32, i32) {
    %c0_i32 = arith.constant 0 : i32
    %c0_i32_0 = arith.constant 0 : i32
    %c0_i32_1 = arith.constant 0 : i32
    return %c0_i32, %c0_i32_0 : i32, i32
  }
  func.func @transform_2(%arg0: i32) -> (i32, i32) {
    %c0_i32 = arith.constant 0 : i32
    %c0_i32_0 = arith.constant 0 : i32
    %c0_i32_1 = arith.constant 0 : i32
    return %c0_i32, %c0_i32_0 : i32, i32
  }
  func.func @transform_3(%arg0: i32) -> (i32, i32) {
    %c0_i32 = arith.constant 0 : i32
    %c0_i32_0 = arith.constant 0 : i32
    %c0_i32_1 = arith.constant 0 : i32
    return %c0_i32, %c0_i32_0 : i32, i32
  }
  func.func @transform_4(%arg0: i32) -> (i32, i32) {
    %c0_i32 = arith.constant 0 : i32
    %c0_i32_0 = arith.constant 0 : i32
    %c0_i32_1 = arith.constant 0 : i32
    return %c0_i32, %c0_i32_0 : i32, i32
  }
  func.func @transform_5(%arg0: i32) -> (i32, i32) {
    %c0_i32 = arith.constant 0 : i32
    %c0_i32_0 = arith.constant 0 : i32
    %c0_i32_1 = arith.constant 0 : i32
    return %c0_i32, %c0_i32_0 : i32, i32
  }
  func.func @transform_6(%arg0: i32) -> (i32, i32) {
    %c0_i32 = arith.constant 0 : i32
    %c0_i32_0 = arith.constant 0 : i32
    %c0_i32_1 = arith.constant 0 : i32
    return %c0_i32, %c0_i32_0 : i32, i32
  }
  func.func @transform_7(%arg0: i32) -> (i32, i32) {
    %c0_i32 = arith.constant 0 : i32
    %c0_i32_0 = arith.constant 0 : i32
    return %arg0, %c0_i32 : i32, i32
  }
}

</mosaic_0001>

<bundles_post_ra>
// kernel: tpu_custom_call.1
= control target key start
LH: loop header
LB: loop body
LE: loop exit
PB: predicated region body
PF: predicated region fallthrough
CT: control target
= control target key end

     0   :  { %12 = vsyncpa [#allocation3], 0  ;;  %s1028_s0 = inlined_call_operand.hbm [shape: bf16[64,128], index: 0, kind: input, shape index: {}]   ;;  %s1029_s1 = inlined_call_operand.hbm [shape: bf16[128,128], index: 1, kind: input, shape index: {}]   ;;  %s1030_s2 = inlined_call_operand.vmem [shape: f32[1,128], index: 2, kind: input, shape index: {}]   ;;  %s1031_s3 = inlined_call_operand.hbm [shape: bf16[128,128], index: 3, kind: input, shape index: {}]   ;;  %s1032_s4 = inlined_call_operand.vmem [shape: f32[1,128], index: 4, kind: input, shape index: {}]   ;;  %s1033_s5 = inlined_call_operand.hbm [shape: bf16[128,128], index: 5, kind: input, shape index: {}]   ;;  %s1034_s6 = inlined_call_operand.vmem [shape: f32[1,128], index: 6, kind: input, shape index: {}]   ;;  %s1035_s7 = inlined_call_operand.hbm [shape: f32[64,128], index: 7, kind: output, shape index: {}]  }
   0x1   :  { %13 = vsyncpa [#allocation6], 0 }
   0x2   :  { %14 = vsyncpa [#allocation9], 0 }
   0x3   :  { %15 = vsyncpa [#allocation4], 0  ;;  %s884_s24 = smov [#allocation5]   ;;  %s885_s26 = smov [#allocation2]  }
   0x4   :  { %s33_s25 = sshll.u32 %s884_s24, 4  ;;  %s21_s27 = sshll.u32 %s885_s26, 4  ;;  %s34_s25 = int_to_ptr.vmem [resolvable:$true] %s33_s25  ;;  %s933_s27 = int_to_ptr.vmem [resolvable:$true] %s21_s27 }
   0x5   :  { %s766_s30 = scalar_lea.hbm %s1029_s1, 1024 }
   0x6   :  { %p767_p0 = scmp.ne.s32.totalorder %s1029_s1, %s766_s30  ;;  %p770_p1 = scmp.lt.u32.totalorder %s766_s30, %s1029_s1 }
   0x8   :  { %p772_p2 = pnand %p770_p1, %p767_p0 }
   0xa   :  { %775 = shalt.err (!%p772_p2)
}
   0xb   :  { %s776_s12 = scalar_lea.vmem %s34_s25, 1024  ;;  %p781_p4 = scmp.lt.s32.totalorder %s34_s25, %s34_s25 }
   0xc   :  { %p777_p3 = scmp.ne.s32.totalorder %s34_s25, %s776_s12  ;;  %p782_p5 = scmp.lt.s32.totalorder %s776_s12, %s776_s12 }
   0xe   :  { %p783_p6 = por %p782_p5, %p781_p4 }
  0x10   :  { %p784_p7 = pnand %p783_p6, %p777_p3 }
  0x12   :  { %787 = shalt.err (!%p784_p7)
}
  0x13   :  { %s886_s13 = smov 64   ;;  %s887_s14 = smov 4  }
  0x14   :  { %39 = dma.hbm_to_vmem [thread:$0]  %s1029_s1, 1024, %s34_s25, [#allocation6], %s886_s13, %s886_s13, %s887_s14  }
  0x15   :  { %s788_s19 = scalar_lea.hbm %s1028_s0, 512 }
  0x16   :  { %p789_p8 = scmp.ne.s32.totalorder %s1028_s0, %s788_s19  ;;  %p792_p9 = scmp.lt.u32.totalorder %s788_s19, %s1028_s0 }
  0x18   :  { %p794_p10 = pnand %p792_p9, %p789_p8 }
  0x1a   :  { %797 = shalt.err (!%p794_p10)
}
  0x1b   :  { %s798_s24 = scalar_lea.vmem %s933_s27, 512  ;;  %p803_p12 = scmp.lt.s32.totalorder %s933_s27, %s933_s27 }
  0x1c   :  { %p799_p11 = scmp.ne.s32.totalorder %s933_s27, %s798_s24  ;;  %p804_p13 = scmp.lt.s32.totalorder %s798_s24, %s798_s24 }
  0x1e   :  { %p805_p0 = por %p804_p13, %p803_p12 }
  0x20   :  { %p806_p1 = pnand %p805_p0, %p799_p11 }
  0x22   :  { %809 = shalt.err (!%p806_p1)
}
  0x23   :  { %27 = dma.hbm_to_vmem [thread:$0]  %s1028_s0, 512, %s933_s27, [#allocation3], %s886_s13, %s886_s13, %s887_s14  }
  0x24   :  { %s888_s26 = smov [#allocation7]   ;;  %s889_s29 = smov [#allocation8]  }
  0x25   :  { %s47_s28 = sshll.u32 %s888_s26, 4  ;;  %s61_s30 = sshll.u32 %s889_s29, 4  ;;  %s48_s28 = int_to_ptr.vmem [resolvable:$true] %s47_s28  ;;  %s970_s30 = int_to_ptr.vmem [resolvable:$true] %s61_s30 }
  0x26   :  { %s810_s10 = scalar_lea.hbm %s1031_s3, 1024 }
  0x27   :  { %p811_p2 = scmp.ne.s32.totalorder %s1031_s3, %s810_s10  ;;  %p814_p3 = scmp.lt.u32.totalorder %s810_s10, %s1031_s3 }
  0x29   :  { %p816_p4 = pnand %p814_p3, %p811_p2 }
  0x2b   :  { %819 = shalt.err (!%p816_p4)
}
  0x2c   :  { %s820_s0 = scalar_lea.vmem %s48_s28, 1024  ;;  %p825_p6 = scmp.lt.s32.totalorder %s48_s28, %s48_s28 }
  0x2d   :  { %p821_p5 = scmp.ne.s32.totalorder %s48_s28, %s820_s0  ;;  %p826_p7 = scmp.lt.s32.totalorder %s820_s0, %s820_s0 }
  0x2f   :  { %p827_p8 = por %p826_p7, %p825_p6 }
  0x31   :  { %p828_p9 = pnand %p827_p8, %p821_p5 }
  0x33   :  { %831 = shalt.err (!%p828_p9)
}
  0x34   :  { %53 = dma.hbm_to_vmem [thread:$0]  %s1031_s3, 1024, %s48_s28, [#allocation6], %s886_s13, %s886_s13, %s887_s14  }
  0x35   :  { %s832_s20 = scalar_lea.hbm %s1033_s5, 1024 }
  0x36   :  { %p833_p10 = scmp.ne.s32.totalorder %s1033_s5, %s832_s20  ;;  %p836_p11 = scmp.lt.u32.totalorder %s832_s20, %s1033_s5 }
  0x38   :  { %p838_p12 = pnand %p836_p11, %p833_p10 }
  0x3a   :  { %841 = shalt.err (!%p838_p12)
}
  0x3b   :  { %s842_s1 = scalar_lea.vmem %s970_s30, 1024  ;;  %p847_p0 = scmp.lt.s32.totalorder %s970_s30, %s970_s30 }
  0x3c   :  { %p843_p13 = scmp.ne.s32.totalorder %s970_s30, %s842_s1  ;;  %p848_p1 = scmp.lt.s32.totalorder %s842_s1, %s842_s1 }
  0x3e   :  { %p849_p2 = por %p848_p1, %p847_p0 }
  0x40   :  { %p850_p3 = pnand %p849_p2, %p843_p13 }
  0x42   :  { %853 = shalt.err (!%p850_p3)
}
  0x43   :  { %67 = dma.hbm_to_vmem [thread:$0]  %s1033_s5, 1024, %s970_s30, [#allocation9], %s886_s13, %s886_s13, %s887_s14  }
  0x44   :  { %876 = dma.done.wait [#allocation3], 512  }
  0x45   :  { %877 = vsyncadd [#allocation3], 4294966784 }
  0x46   :  { %878 = dma.done.wait [#allocation6], 2048  }
  0x47   :  { %879 = vsyncadd [#allocation6], 4294965248 }
  0x48   :  { %880 = dma.done.wait [#allocation9], 1024  }
  0x49   :  { %881 = vsyncadd [#allocation9], 4294966272  ;;  %v738_v0 = vld [vmem:[#allocation5] sm:$0xff]   ;;  %v739_v1 = vld [vmem:[#allocation5 + $0x8] sm:$0xff]   ;;  %s890_s28 = smov [#allocation10]  }
  0x4a   :  { %641 = vmatprep.subr.bf16.mxu0 %v738_v0  ;;  %v740_v2 = vld [vmem:[#allocation5 + $0x10] sm:$0xff]   ;;  %v741_v3 = vld [vmem:[#allocation5 + $0x18] sm:$0xff]   ;;  %v746_v4 = vld [vmem:[#allocation2] sm:$0xff]   ;;  %s560_s29 = sshll.u32 %s890_s28, 4  ;;  %s561_s29 = int_to_ptr.vmem [resolvable:$true] %s560_s29 }
  0x4b   :  { %642 = vmatpush3.bf16.msra.mxu0 %v738_v0  ;;  %657 = vmatprep.mubr.bf16.mxu0 %v746_v4  ;;  %v742_v5 = vld [vmem:[#allocation5 + $0x20] sm:$0xff]   ;;  %v751_v7 = vld [vmem:[#allocation7 + $0x8] sm:$0xff]   ;;  %v752_v9 = vld [vmem:[#allocation7 + $0x10] sm:$0xff]   ;;  %p859_p5 = scmp.lt.s32.totalorder %s561_s29, %s561_s29 }
  0x4c   :  { %643 = vmatprep.subr.bf16.mxu0 %v739_v1  ;;  %v750_v6 = vld [vmem:[#allocation7] sm:$0xff]   ;;  %v743_v8 = vld [vmem:[#allocation5 + $0x28] sm:$0xff]   ;;  %v744_v10 = vld [vmem:[#allocation5 + $0x30] sm:$0xff]  }
  0x4d   :  { %665 = vmatprep.subr.bf16.mxu1 %v750_v6  ;;  %v753_v11 = vld [vmem:[#allocation7 + $0x18] sm:$0xff]   ;;  %v754_v13 = vld [vmem:[#allocation7 + $0x20] sm:$0xff]   ;;  %v755_v14 = vld [vmem:[#allocation7 + $0x28] sm:$0xff]  }
  0x4e   :  { %666 = vmatpush3.bf16.msra.mxu1 %v750_v6  ;;  %v745_v12 = vld [vmem:[#allocation5 + $0x38] sm:$0xff]   ;;  %v747_v15 = vld [vmem:[#allocation2 + $0x8] sm:$0xff]   ;;  %v748_v16 = vld [vmem:[#allocation2 + $0x10] sm:$0xff]  }
  0x4f   :  { %644 = vmatpush3.bf16.msra.mxu0 %v739_v1  ;;  %667 = vmatprep.subr.bf16.mxu1 %v751_v7  ;;  %v749_v17 = vld [vmem:[#allocation2 + $0x18] sm:$0xff]   ;;  %v756_v18 = vld [vmem:[#allocation7 + $0x30] sm:$0xff]   ;;  %v758_v20 = vld [vmem:[#allocation8] sm:$0xff]  }
  0x50   :  { %645 = vmatprep.subr.bf16.mxu0 %v740_v2  ;;  %v757_v19 = vld [vmem:[#allocation7 + $0x38] sm:$0xff]   ;;  %v759_v21 = vld [vmem:[#allocation8 + $0x8] sm:$0xff]   ;;  %v760_v22 = vld [vmem:[#allocation8 + $0x10] sm:$0xff]  }
  0x51   :  { %v761_v23 = vld [vmem:[#allocation8 + $0x18] sm:$0xff]   ;;  %v762_v24 = vld [vmem:[#allocation8 + $0x20] sm:$0xff]   ;;  %v763_v25 = vld [vmem:[#allocation8 + $0x28] sm:$0xff]  }
  0x52   :  { %668 = vmatpush3.bf16.msra.mxu1 %v751_v7  ;;  %v574_v26 = vld [vmem:[%s1030_s2] ss:$0 sm:$0xff]  ;;  %v764_v55 = vld [vmem:[#allocation8 + $0x30] sm:$0xff]   ;;  %v765_v56 = vld [vmem:[#allocation8 + $0x38] sm:$0xff]  }
  0x53   :  { %646 = vmatpush3.bf16.msra.mxu0 %v740_v2  ;;  %669 = vmatprep.subr.bf16.mxu1 %v752_v9  ;;  %v587_v57 = vld [vmem:[%s1032_s4] ss:$0 sm:$0xff] }
  0x54   :  { %647 = vmatprep.subr.bf16.mxu0 %v741_v3 }
  0x56   :  { %670 = vmatpush3.bf16.msra.mxu1 %v752_v9 }
  0x57   :  { %648 = vmatpush3.bf16.msra.mxu0 %v741_v3  ;;  %671 = vmatprep.subr.bf16.mxu1 %v753_v11 }
  0x58   :  { %649 = vmatprep.subr.bf16.mxu0 %v742_v5 }
  0x5a   :  { %672 = vmatpush3.bf16.msra.mxu1 %v753_v11 }
  0x5b   :  { %650 = vmatpush3.bf16.msra.mxu0 %v742_v5  ;;  %673 = vmatprep.subr.bf16.mxu1 %v754_v13 }
  0x5c   :  { %651 = vmatprep.subr.bf16.mxu0 %v743_v8 }
  0x5e   :  { %674 = vmatpush3.bf16.msra.mxu1 %v754_v13 }
  0x5f   :  { %652 = vmatpush3.bf16.msra.mxu0 %v743_v8  ;;  %675 = vmatprep.subr.bf16.mxu1 %v755_v14 }
  0x60   :  { %653 = vmatprep.subr.bf16.mxu0 %v744_v10 }
  0x62   :  { %676 = vmatpush3.bf16.msra.mxu1 %v755_v14 }
  0x63   :  { %654 = vmatpush3.bf16.msra.mxu0 %v744_v10  ;;  %677 = vmatprep.subr.bf16.mxu1 %v756_v18 }
  0x64   :  { %655 = vmatprep.subr.bf16.mxu0 %v745_v12 }
  0x66   :  { %678 = vmatpush3.bf16.msra.mxu1 %v756_v18 }
  0x67   :  { %656 = vmatpush3.bf16.msra.mxu0 %v745_v12  ;;  %679 = vmatprep.subr.bf16.mxu1 %v757_v19 }
  0x68   :  { %689 = vmatprep.subr.bf16.mxu0 %v758_v20 }
  0x6a   :  { %658 = vmatmul.mubr.bf16.vlgmr.msra.gmra.mrb[0].mxu0 %v747_v15  ;;  %680 = vmatpush3.bf16.msra.mxu1 %v757_v19 }
  0x6b   :  { %661 = vmatprep.mubr.bf16.mxu0 %v748_v16  ;;  %713 = vmatprep.subr.bf16.mxu1 %v758_v20 }
  0x6c   :  { %690 = vmatpush3.bf16.msra.mxu0 %v758_v20 }
  0x6d   :  { %691 = vmatprep.subr.bf16.mxu0 %v759_v21 }
  0x70   :  { %692 = vmatpush3.bf16.msra.mxu0 %v759_v21 }
  0x71   :  { %693 = vmatprep.subr.bf16.mxu0 %v760_v22 }
  0x72   :  { %662 = vmatmul.mubr.bf16.gmra.mrb[4].mxu0 %v749_v17 }
  0x74   :  { %694 = vmatpush3.bf16.msra.mxu0 %v760_v22 }
  0x75   :  { %695 = vmatprep.subr.bf16.mxu0 %v761_v23 }
  0x78   :  { %696 = vmatpush3.bf16.msra.mxu0 %v761_v23 }
  0x79   :  { %697 = vmatprep.subr.bf16.mxu0 %v762_v24 }
  0x7c   :  { %698 = vmatpush3.bf16.msra.mxu0 %v762_v24 }
  0x7d   :  { %699 = vmatprep.subr.bf16.mxu0 %v763_v25 }
  0x80   :  { %700 = vmatpush3.bf16.msra.mxu0 %v763_v25 }
  0x81   :  { %701 = vmatprep.subr.bf16.mxu0 %v764_v55 }
  0x84   :  { %702 = vmatpush3.bf16.msra.mxu0 %v764_v55 }
  0x85   :  { %703 = vmatprep.subr.bf16.mxu0 %v765_v56 }
  0x88   :  { %704 = vmatpush3.bf16.msra.mxu0 %v765_v56 }
 0x13d   :  { %v659_v27 = vpop.f32.mrb[0].mxu0 }
 0x13e   :  { %v229_v28 = vadd.f32 %v659_v27, %v574_v26  ;;  %v220_v29 = vpop.f32.mrb[1].mxu0 }
 0x13f   :  { %v221_v30 = vadd.f32 %v574_v26, %v220_v29  ;;  %v660_v31 = vpop.f32.mrb[2].mxu0 }
 0x140   :  { %v232_v32 = vadd.f32 %v660_v31, %v574_v26  ;;  %v223_v33 = vpop.f32.mrb[3].mxu0  ;;  %v253_v35 = vmax.f32 %v229_v28, 0.0 }
 0x141   :  { %v224_v34 = vadd.f32 %v574_v26, %v223_v33  ;;  %v251_v37 = vmax.f32 %v221_v30, 0.0 }
 0x142   :  { %v254_v36 = vmax.f32 %v232_v32, 0.0 }
 0x143   :  { %v252_v38 = vmax.f32 %v224_v34, 0.0 }
 0x144   :  { %v260_v39 = vpack.c.bf16 %v254_v36, %v253_v35 }
 0x145   :  { %v663_v40 = vpop.f32.mrb[4].mxu0  ;;  %v259_v41 = vpack.c.bf16 %v252_v38, %v251_v37 }
 0x146   :  { %v245_v42 = vadd.f32 %v663_v40, %v574_v26  ;;  %v236_v43 = vpop.f32.mrb[5].mxu0 }
 0x147   :  { %v237_v44 = vadd.f32 %v574_v26, %v236_v43  ;;  %v664_v45 = vpop.f32.mrb[6].mxu0  ;;  %681 = vmatprep.mubr.bf16.mxu1 %v259_v41 }
 0x148   :  { %v248_v46 = vadd.f32 %v664_v45, %v574_v26  ;;  %v239_v47 = vpop.f32.mrb[7].mxu0  ;;  %682 = vmatmul.mubr.bf16.vlgmr.msra.gmra.mrb[0].mxu1 %v260_v39  ;;  %v257_v49 = vmax.f32 %v245_v42, 0.0 }
 0x149   :  { %v240_v48 = vadd.f32 %v574_v26, %v239_v47  ;;  %721 = vmatpush3.bf16.msra.mxu1 %v758_v20  ;;  %v255_v51 = vmax.f32 %v237_v44, 0.0 }
 0x14a   :  { %v258_v50 = vmax.f32 %v248_v46, 0.0  ;;  %714 = vmatprep.subr.bf16.mxu1 %v759_v21 }
 0x14b   :  { %v256_v52 = vmax.f32 %v240_v48, 0.0 }
 0x14c   :  { %v262_v53 = vpack.c.bf16 %v258_v50, %v257_v49 }
 0x14d   :  { %v261_v54 = vpack.c.bf16 %v256_v52, %v255_v51  ;;  %722 = vmatpush3.bf16.msra.mxu1 %v759_v21 }
 0x14e   :  { %715 = vmatprep.subr.bf16.mxu1 %v760_v22 }
 0x14f   :  { %685 = vmatprep.mubr.bf16.mxu1 %v261_v54 }
 0x150   :  { %686 = vmatmul.mubr.bf16.gmra.mrb[4].mxu1 %v262_v53 }
 0x151   :  { %723 = vmatpush3.bf16.msra.mxu1 %v760_v22  ;;  %v596_v22 = vld [vmem:[%s1034_s6] ss:$0 sm:$0xff]  ;;  %s854_s6 = scalar_lea.vmem %s561_s29, 1024 }
 0x152   :  { %716 = vmatprep.subr.bf16.mxu1 %v761_v23  ;;  %p855_p4 = scmp.ne.s32.totalorder %s561_s29, %s854_s6  ;;  %p860_p6 = scmp.lt.s32.totalorder %s854_s6, %s854_s6 }
 0x154   :  { %p861_p7 = por %p860_p6, %p859_p5 }
 0x155   :  { %724 = vmatpush3.bf16.msra.mxu1 %v761_v23 }
 0x156   :  { %717 = vmatprep.subr.bf16.mxu1 %v762_v24  ;;  %p862_p8 = pnand %p861_p7, %p855_p4 }
 0x159   :  { %725 = vmatpush3.bf16.msra.mxu1 %v762_v24 }
 0x15a   :  { %718 = vmatprep.subr.bf16.mxu1 %v763_v25 }
 0x15d   :  { %726 = vmatpush3.bf16.msra.mxu1 %v763_v25 }
 0x15e   :  { %719 = vmatprep.subr.bf16.mxu1 %v764_v55 }
 0x161   :  { %727 = vmatpush3.bf16.msra.mxu1 %v764_v55 }
 0x162   :  { %720 = vmatprep.subr.bf16.mxu1 %v765_v56 }
 0x165   :  { %728 = vmatpush3.bf16.msra.mxu1 %v765_v56 }
 0x21b   :  { %v683_v58 = vpop.f32.mrb[0].mxu1 }
 0x21c   :  { %v377_v59 = vadd.f32 %v683_v58, %v587_v57  ;;  %v368_v60 = vpop.f32.mrb[1].mxu1 }
 0x21d   :  { %v369_v61 = vadd.f32 %v587_v57, %v368_v60  ;;  %v684_v62 = vpop.f32.mrb[2].mxu1 }
 0x21e   :  { %v380_v63 = vadd.f32 %v684_v62, %v587_v57  ;;  %v371_v0 = vpop.f32.mrb[3].mxu1  ;;  %v401_v2 = vmax.f32 %v377_v59, 0.0 }
 0x21f   :  { %v372_v1 = vadd.f32 %v587_v57, %v371_v0  ;;  %v399_v4 = vmax.f32 %v369_v61, 0.0 }
 0x220   :  { %v402_v3 = vmax.f32 %v380_v63, 0.0 }
 0x221   :  { %v400_v5 = vmax.f32 %v372_v1, 0.0 }
 0x222   :  { %v408_v6 = vpack.c.bf16 %v402_v3, %v401_v2 }
 0x223   :  { %v407_v7 = vpack.c.bf16 %v400_v5, %v399_v4  ;;  %v687_v8 = vpop.f32.mrb[4].mxu1 }
 0x224   :  { %v393_v9 = vadd.f32 %v687_v8, %v587_v57  ;;  %v384_v10 = vpop.f32.mrb[5].mxu1 }
 0x225   :  { %v385_v11 = vadd.f32 %v587_v57, %v384_v10  ;;  %v688_v12 = vpop.f32.mrb[6].mxu1  ;;  %705 = vmatprep.mubr.bf16.mxu0 %v407_v7 }
 0x226   :  { %v396_v13 = vadd.f32 %v688_v12, %v587_v57  ;;  %v387_v14 = vpop.f32.mrb[7].mxu1  ;;  %706 = vmatmul.mubr.bf16.vlgmr.msra.gmra.mrb[8].mxu0 %v408_v6  ;;  %v405_v16 = vmax.f32 %v393_v9, 0.0 }
 0x227   :  { %v388_v15 = vadd.f32 %v587_v57, %v387_v14  ;;  %v403_v18 = vmax.f32 %v385_v11, 0.0 }
 0x228   :  { %v406_v17 = vmax.f32 %v396_v13, 0.0 }
 0x229   :  { %v404_v19 = vmax.f32 %v388_v15, 0.0 }
 0x22a   :  { %v410_v20 = vpack.c.bf16 %v406_v17, %v405_v16 }
 0x22b   :  { %v409_v21 = vpack.c.bf16 %v404_v19, %v403_v18 }
 0x22d   :  { %709 = vmatprep.mubr.bf16.mxu1 %v409_v21 }
 0x22e   :  { %710 = vmatmul.mubr.bf16.vlgmr.msra.gmra.mrb[8].mxu1 %v410_v20 }
 0x2f9   :  { %v707_v23 = vpop.f32.mrb[8].mxu0 }
 0x2fa   :  { %v525_v24 = vadd.f32 %v707_v23, %v596_v22  ;;  %v516_v25 = vpop.f32.mrb[9].mxu0 }
 0x2fb   :  { %v517_v26 = vadd.f32 %v596_v22, %v516_v25  ;;  %v708_v27 = vpop.f32.mrb[10].mxu0 }
 0x2fc   :  { %549 = vst [vmem:[#allocation10 + $0x10] sm:$0xff] %v525_v24  ;;  %v528_v28 = vadd.f32 %v708_v27, %v596_v22  ;;  %v519_v29 = vpop.f32.mrb[11].mxu0 }
 0x2fd   :  { %547 = vst [vmem:[#allocation10] sm:$0xff] %v517_v26  ;;  %v520_v30 = vadd.f32 %v596_v22, %v519_v29 }
 0x2fe   :  { %550 = vst [vmem:[#allocation10 + $0x18] sm:$0xff] %v528_v28 }
 0x2ff   :  { %548 = vst [vmem:[#allocation10 + $0x8] sm:$0xff] %v520_v30 }
 0x301   :  { %v711_v31 = vpop.f32.mrb[8].mxu1 }
 0x302   :  { %v541_v32 = vadd.f32 %v711_v31, %v596_v22  ;;  %v532_v33 = vpop.f32.mrb[9].mxu1 }
 0x303   :  { %v533_v34 = vadd.f32 %v596_v22, %v532_v33  ;;  %v712_v35 = vpop.f32.mrb[10].mxu1 }
 0x304   :  { %553 = vst [vmem:[#allocation10 + $0x30] sm:$0xff] %v541_v32  ;;  %v544_v36 = vadd.f32 %v712_v35, %v596_v22  ;;  %v535_v37 = vpop.f32.mrb[11].mxu1 }
 0x305   :  { %551 = vst [vmem:[#allocation10 + $0x20] sm:$0xff] %v533_v34  ;;  %v536_v38 = vadd.f32 %v596_v22, %v535_v37 }
 0x306   :  { %554 = vst [vmem:[#allocation10 + $0x38] sm:$0xff] %v544_v36 }
 0x307   :  { %552 = vst [vmem:[#allocation10 + $0x28] sm:$0xff] %v536_v38 }
 0x308   :  { %865 = shalt.err (!%p862_p8)
}
 0x309   :  { %s866_s9 = scalar_lea.hbm %s1035_s7, 1024 }
 0x30a   :  { %p867_p9 = scmp.ne.s32.totalorder %s1035_s7, %s866_s9  ;;  %p870_p10 = scmp.lt.u32.totalorder %s866_s9, %s1035_s7 }
 0x30c   :  { %p872_p11 = pnand %p870_p10, %p867_p9 }
 0x30e   :  { %875 = shalt.err (!%p872_p11)
}
 0x30f   :  { %s891_s16 = smov 128   ;;  %s892_s0 = smov 8  }
 0x310   :  { %566 = dma.vmem_to_hbm [thread:$0]  %s561_s29, 1024, %s1035_s7, [#allocation4], %s891_s16, %s891_s16, %s892_s0  }
 0x311   :  { %882 = dma.done.wait [#allocation4], 1024  }
 0x312   :  { %883 = vsyncadd [#allocation4], 4294966272 }
 0x313   :  { %570 = vsyncpa [#allocation3], 1 }
 0x314   :  { %571 = vsyncpa [#allocation6], 1 }
 0x315   :  { %572 = vsyncpa [#allocation9], 1 }
 0x316   :  { %573 = vsyncpa [#allocation4], 1 }

</bundles_post_ra>
